<compile_context>
chip_gen: v6e
topology: v6e:2x2x1
jax: 0.10.0
libtpu: 0.0.40
codegen_flags: <defaults>
</compile_context>

<pallas_src>
import functools

import jax
import jax.numpy as jnp
from jax.experimental import pallas as pl
from jax.experimental.pallas import tpu as pltpu


def _round_up(x: int, m: int) -> int:
    return (x + m - 1) // m * m


def _dtype_min(dtype):
    dtype = jnp.dtype(dtype)
    if jnp.issubdtype(dtype, jnp.floating):
        # -inf so rows that are entirely -inf still reduce correctly.
        return float("-inf")
    if jnp.issubdtype(dtype, jnp.integer):
        return int(jnp.iinfo(dtype).min)
    raise ValueError(f"unsupported dtype for global max pool: {dtype}")


def _global_max_pool_kernel(x_ref, o_ref, *, min_val):
    # x_ref: (Bt, S_tile, F_tile) VMEM tile
    # o_ref: (Bt, F_tile)         resident output block (same block for all
    #                             steps along the S grid axis -> accumulator)
    @pl.when(pl.program_id(2) == 0)
    def _init():
        o_ref[...] = jnp.full(o_ref.shape, min_val, dtype=o_ref.dtype)

    # Per-chunk cross-sublane reduce over S_tile, then elementwise running max.
    o_ref[...] = jnp.maximum(o_ref[...], jnp.max(x_ref[...], axis=1))


def global_max_pool_1d(x: jax.Array, keepdims: bool = False) -> jax.Array:
    """Keras-style GlobalMaxPool1D over the steps axis (axis=1)."""
    B, S, F = x.shape
    dtype = x.dtype
    min_val = _dtype_min(dtype)

    # --- tile selection -----------------------------------------------------
    Bt = 8                                    # sublane-dense output rows
    F_pad = _round_up(F, 128)                 # lane-dense features
    F_tile = next(t for t in (512, 256, 128) if F_pad % t == 0)
    S_tile = 512 if S >= 512 else _round_up(S, 8)
    B_pad = _round_up(B, Bt)
    S_pad = _round_up(S, S_tile)

    # --- pad with dtype-min so padding never wins the max --------------------
    if (B_pad, S_pad, F_pad) != (B, S, F):
        x = jnp.pad(
            x,
            ((0, B_pad - B), (0, S_pad - S), (0, F_pad - F)),
            mode="constant",
            constant_values=min_val,
        )

    grid = (B_pad // Bt, F_pad // F_tile, S_pad // S_tile)  # reduction axis last

    itemsize = jnp.dtype(dtype).itemsize
    in_block_bytes = Bt * S_tile * F_tile * itemsize
    out_block_bytes = Bt * F_tile * itemsize
    # double-buffered input + output, with slack; stay within v7x scoped budget
    vmem_limit = int(min(32 * 1024 * 1024,
                         max(4 * 1024 * 1024,
                             4 * (in_block_bytes + out_block_bytes))))

    kernel = functools.partial(_global_max_pool_kernel, min_val=min_val)

    out = pl.pallas_call(
        kernel,
        out_shape=jax.ShapeDtypeStruct((B_pad, F_pad), dtype),
        grid_spec=pltpu.PrefetchScalarGridSpec(
            num_scalar_prefetch=0,
            grid=grid,
            in_specs=[
                pl.BlockSpec((Bt, S_tile, F_tile), lambda b, f, s: (b, s, f)),
            ],
            out_specs=pl.BlockSpec((Bt, F_tile), lambda b, f, s: (b, f)),
        ),
        compiler_params=pltpu.CompilerParams(
            dimension_semantics=("parallel", "parallel", "arbitrary"),
            vmem_limit_bytes=vmem_limit,
        ),
    )(x)

    out = out[:B, :F]
    if keepdims:
        out = out.reshape(B, F, 1)
    return out


if __name__ == "__main__":
    key = jax.random.PRNGKey(0)

    # --- small demo shape consistent with the module (B, S, F) --------------
    B, S, F = 2, 8, 32
    x = jax.random.normal(key, (B, S, F), dtype=jnp.float32)

    y = jax.block_until_ready(global_max_pool_1d(x, keepdims=False))
    y_ref = jnp.max(x, axis=1)
    assert y.shape == (B, F), y.shape
    assert jnp.allclose(y, y_ref), "mismatch vs reference (keepdims=False)"

    yk = jax.block_until_ready(global_max_pool_1d(x, keepdims=True))
    assert yk.shape == (B, F, 1), yk.shape
    assert jnp.allclose(yk[..., 0], y_ref), "mismatch vs reference (keepdims=True)"

    # --- non-divisible shapes exercise the pad/strip + S-tiling path --------
    key2 = jax.random.PRNGKey(1)
    B2, S2, F2 = 5, 37, 200
    x2 = jax.random.normal(key2, (B2, S2, F2), dtype=jnp.float32)
    y2 = jax.block_until_ready(global_max_pool_1d(x2))
    assert y2.shape == (B2, F2), y2.shape
    assert jnp.allclose(y2, jnp.max(x2, axis=1)), "mismatch on padded shapes"

    print("KERNEL_OK")
</pallas_src>

<mosaic_0001>
module attributes {stable_mosaic.version = 11 : i64} {
  func.func @_global_max_pool_kernel(%arg0: i32, %arg1: i32, %arg2: i32, %arg3: memref<8x8x128xf32, #tpu.memory_space<vmem>>, %arg4: memref<8x128xf32, #tpu.memory_space<vmem>>) attributes {dimension_semantics = [#tpu.dimension_semantics<parallel>, #tpu.dimension_semantics<parallel>, #tpu.dimension_semantics<arbitrary>], iteration_bounds = array<i64: 1, 1, 1>, scalar_prefetch = 0 : i64, scratch_operands = 0 : i64, tpu.core_type = #tpu.core_type<tc>, window_params = [{transform_indices = @transform_0, window_bounds = array<i64: 8, 8, 128>}, {transform_indices = @transform_1, window_bounds = array<i64: 8, 128>}]} {
    %c0_i32 = arith.constant 0 : i32
    %0 = arith.cmpi eq, %arg2, %c0_i32 : i32
    %1 = arith.extui %0 : i1 to i32
    %c0_i32_0 = arith.constant 0 : i32
    %2 = arith.cmpi ne, %1, %c0_i32_0 : i32
    scf.if %2 {
      %cst_7 = arith.constant 0xFF800000 : f32
      %8 = vector.broadcast %cst_7 : f32 to vector<8x128xf32>
      %c0_8 = arith.constant 0 : index
      %c0_9 = arith.constant 0 : index
      %9 = vector.load %arg4[%c0_8, %c0_9] : memref<8x128xf32, #tpu.memory_space<vmem>>, vector<8x128xf32>
      tpu.vector_store %arg4[%c0_8, %c0_9], %8 {strides = array<i32>} : memref<8x128xf32, #tpu.memory_space<vmem>>, vector<8x128xf32>,
    } else {
    }
    %c0 = arith.constant 0 : index
    %c0_1 = arith.constant 0 : index
    %3 = vector.load %arg4[%c0, %c0_1] : memref<8x128xf32, #tpu.memory_space<vmem>>, vector<8x128xf32>
    %c0_2 = arith.constant 0 : index
    %c0_3 = arith.constant 0 : index
    %c0_4 = arith.constant 0 : index
    %4 = vector.load %arg3[%c0_2, %c0_3, %c0_4] : memref<8x8x128xf32, #tpu.memory_space<vmem>>, vector<8x8x128xf32>
    %cst = arith.constant dense<0xFF800000> : vector<8x128xf32>
    %5 = vector.multi_reduction <maximumf>, %4, %cst [1] : vector<8x8x128xf32> to vector<8x128xf32>
    %6 = arith.maximumf %3, %5 : vector<8x128xf32>
    %c0_5 = arith.constant 0 : index
    %c0_6 = arith.constant 0 : index
    %7 = vector.load %arg4[%c0_5, %c0_6] : memref<8x128xf32, #tpu.memory_space<vmem>>, vector<8x128xf32>
    tpu.vector_store %arg4[%c0_5, %c0_6], %6 {strides = array<i32>} : memref<8x128xf32, #tpu.memory_space<vmem>>, vector<8x128xf32>,
    return
  }
  func.func @transform_0(%arg0: i32, %arg1: i32, %arg2: i32) -> (i32, i32, i32) {
    %c0_i32 = arith.constant 0 : i32
    return %arg0, %arg2, %arg1 : i32, i32, i32
  }
  func.func @transform_1(%arg0: i32, %arg1: i32, %arg2: i32) -> (i32, i32) {
    %c0_i32 = arith.constant 0 : i32
    return %arg0, %arg1 : i32, i32
  }
}

</mosaic_0001>

<bundles_post_ra>
// kernel: tpu_custom_call.1
= control target key start
LH: loop header
LB: loop body
LE: loop exit
PB: predicated region body
PF: predicated region fallthrough
CT: control target
= control target key end

     0   :  { %6 = vsyncpa [#allocation3], 0  ;;  %s196_s0 = inlined_call_operand.hbm [shape: f32[8,8,128], index: 0, kind: input, shape index: {}]   ;;  %s197_s1 = inlined_call_operand.hbm [shape: f32[8,128], index: 1, kind: output, shape index: {}]  }
   0x1   :  { %7 = vsyncpa [#allocation4], 0  ;;  %s174_s6 = smov [#allocation2]  }
   0x2   :  { %s13_s7 = sshll.u32 %s174_s6, 4  ;;  %s14_s7 = int_to_ptr.vmem [resolvable:$true] %s13_s7 }
   0x3   :  { %s138_s8 = scalar_lea.vmem %s14_s7, 1024  ;;  %p143_p1 = scmp.lt.s32.totalorder %s14_s7, %s14_s7 }
   0x4   :  { %p139_p0 = scmp.ne.s32.totalorder %s14_s7, %s138_s8  ;;  %p144_p2 = scmp.lt.s32.totalorder %s138_s8, %s138_s8 }
   0x6   :  { %p145_p3 = por %p144_p2, %p143_p1 }
   0x8   :  { %p146_p4 = pnand %p145_p3, %p139_p0 }
   0xa   :  { %149 = shalt.err (!%p146_p4)
}
   0xb   :  { %s175_s9 = smov 128   ;;  %s176_s10 = smov 8  }
   0xc   :  { %19 = dma.hbm_to_vmem [thread:$0]  %s196_s0, 1024, %s14_s7, [#allocation3], %s175_s9, %s175_s9, %s176_s10  }
   0xd   :  { %170 = dma.done.wait [#allocation3], 1024  }
   0xe   :  { %171 = vsyncadd [#allocation3], 4294966272  ;;  %v29_v0 = vld [vmem:[#allocation2] sm:$0xff]  ;;  %v30_v1 = vld [vmem:[#allocation2 + $0x8] sm:$0xff]  ;;  %vm93_vm0 = vcmask 1041409   ;;  %vm95_vm1 = vcmask 1042434  }
   0xf   :  { %v31_v2 = vld [vmem:[#allocation2 + $0x10] sm:$0xff]  ;;  %v32_v3 = vld [vmem:[#allocation2 + $0x18] sm:$0xff]  ;;  %v33_v4 = vld [vmem:[#allocation2 + $0x20] sm:$0xff]  ;;  %v37_v6 = vrot.slane %v29_v0, 4  ;;  %v43_v7 = vrot.slane %v30_v1, 4  ;;  %vm97_vm2 = vcmask 1043459  }
  0x10   :  { %v34_v5 = vld [vmem:[#allocation2 + $0x28] sm:$0xff]  ;;  %v49_v8 = vrot.slane %v31_v2, 4  ;;  %v35_v9 = vld [vmem:[#allocation2 + $0x30] sm:$0xff]  ;;  %v36_v10 = vld [vmem:[#allocation2 + $0x38] sm:$0xff]  ;;  %v55_v11 = vrot.slane %v32_v3, 4  ;;  %v61_v12 = vrot.slane %v33_v4, 4 }
  0x11   :  { %v67_v13 = vrot.slane %v34_v5, 4  ;;  %v38_v14 = vmax.f32 %v29_v0, %v37_v6  ;;  %v44_v15 = vmax.f32 %v30_v1, %v43_v7  ;;  %v73_v17 = vrot.slane %v35_v9, 4  ;;  %s177_s0 = smov [#allocation5]  }
  0x12   :  { %v50_v16 = vmax.f32 %v31_v2, %v49_v8  ;;  %v56_v18 = vmax.f32 %v32_v3, %v55_v11  ;;  %v62_v19 = vmax.f32 %v33_v4, %v61_v12  ;;  %v79_v21 = vrot.slane %v36_v10, 4  ;;  %s116_s13 = sshll.u32 %s177_s0, 4  ;;  %s117_s13 = int_to_ptr.vmem [resolvable:$true] %s116_s13 }
  0x13   :  { %v68_v20 = vmax.f32 %v34_v5, %v67_v13  ;;  %v39_v22 = vrot.slane %v38_v14, 2  ;;  %v45_v23 = vrot.slane %v44_v15, 2  ;;  %v74_v25 = vmax.f32 %v35_v9, %v73_v17  ;;  %s150_s14 = scalar_lea.vmem %s117_s13, 128  ;;  %p155_p6 = scmp.lt.s32.totalorder %s117_s13, %s117_s13 }
  0x14   :  { %v51_v24 = vrot.slane %v50_v16, 2  ;;  %v57_v26 = vrot.slane %v56_v18, 2  ;;  %v63_v27 = vrot.slane %v62_v19, 2  ;;  %v80_v29 = vmax.f32 %v36_v10, %v79_v21  ;;  %p151_p5 = scmp.ne.s32.totalorder %s117_s13, %s150_s14  ;;  %p156_p7 = scmp.lt.s32.totalorder %s150_s14, %s150_s14 }
  0x15   :  { %v69_v28 = vrot.slane %v68_v20, 2  ;;  %v40_v30 = vmax.f32 %v38_v14, %v39_v22  ;;  %v46_v31 = vmax.f32 %v44_v15, %v45_v23  ;;  %v75_v33 = vrot.slane %v74_v25, 2 }
  0x16   :  { %v52_v32 = vmax.f32 %v50_v16, %v51_v24  ;;  %v58_v34 = vmax.f32 %v56_v18, %v57_v26  ;;  %v64_v35 = vmax.f32 %v62_v19, %v63_v27  ;;  %v81_v37 = vrot.slane %v80_v29, 2  ;;  %p157_p8 = por %p156_p7, %p155_p6 }
  0x17   :  { %v70_v36 = vmax.f32 %v68_v20, %v69_v28  ;;  %v41_v38 = vrot.slane %v40_v30, 1  ;;  %v47_v39 = vrot.slane %v46_v31, 1  ;;  %v76_v41 = vmax.f32 %v74_v25, %v75_v33 }
  0x18   :  { %v53_v40 = vrot.slane %v52_v32, 1  ;;  %v59_v42 = vrot.slane %v58_v34, 1  ;;  %v65_v43 = vrot.slane %v64_v35, 1  ;;  %v82_v45 = vmax.f32 %v80_v29, %v81_v37  ;;  %p158_p9 = pnand %p157_p8, %p151_p5 }
  0x19   :  { %v71_v44 = vrot.slane %v70_v36, 1  ;;  %v42_v46 = vmax.f32 %v40_v30, %v41_v38  ;;  %v48_v47 = vmax.f32 %v46_v31, %v47_v39  ;;  %v77_v49 = vrot.slane %v76_v41, 1 }
  0x1a   :  { %v54_v48 = vmax.f32 %v52_v32, %v53_v40  ;;  %v60_v50 = vmax.f32 %v58_v34, %v59_v42  ;;  %v66_v51 = vmax.f32 %v64_v35, %v65_v43  ;;  %v83_v52 = vrot.slane %v82_v45, 1 }
  0x1b   :  { %v72_v53 = vmax.f32 %v70_v36, %v71_v44  ;;  %v94_v54 = vsel %vm93_vm0, %v48_v47, %v42_v46  ;;  %vm99_vm3 = vcmask 1044484   ;;  %v78_v55 = vmax.f32 %v76_v41, %v77_v49 }
  0x1c   :  { %v96_v56 = vsel %vm95_vm1, %v54_v48, %v94_v54  ;;  %vm101_vm4 = vcmask 1045509   ;;  %v84_v57 = vmax.f32 %v82_v45, %v83_v52  ;;  %vm103_vm5 = vcmask 1046534  }
  0x1d   :  { %v98_v58 = vsel %vm97_vm2, %v60_v50, %v96_v56  ;;  %vm105_vm6 = vcmask 1047559  }
  0x1e   :  { %v100_v59 = vsel %vm99_vm3, %v66_v51, %v98_v58 }
  0x1f   :  { %v102_v60 = vsel %vm101_vm4, %v72_v53, %v100_v59 }
  0x20   :  { %v104_v61 = vsel %vm103_vm5, %v78_v55, %v102_v60 }
  0x21   :  { %v106_v62 = vsel %vm105_vm6, %v84_v57, %v104_v61 }
  0x22   :  { %109 = vst [vmem:[#allocation5] sm:$0xff] %v106_v62 }
  0x23   :  { %161 = shalt.err (!%p158_p9)
}
  0x24   :  { %119 = dma.vmem_to_hbm [thread:$0]  %s117_s13, 128, %s197_s1, [#allocation4]  }
  0x25   :  { %172 = dma.done.wait [#allocation4], 128  }
  0x26   :  { %173 = vsyncadd [#allocation4], 4294967168 }
  0x27   :  { %123 = vsyncpa [#allocation3], 1 }
  0x28   :  { %124 = vsyncpa [#allocation4], 1 }

</bundles_post_ra>
